<compile_context>
chip_gen: v7x
topology: tpu7x:2x2x1
jax: 0.10.0
libtpu: 0.0.40
codegen_flags: <defaults>
</compile_context>

<pallas_src>
import functools

import jax
import jax.numpy as jnp
from jax.experimental import pallas as pl
from jax.experimental.pallas import tpu as pltpu


def _round_up(x, m):
    return ((x + m - 1) // m) * m


def _choose_tiling(B, tile_b=None, max_tile_lanes=8192):
    """Pick (tile_b, b_pad, n_tiles) for the batch-on-lanes grid.

    Pads the batch only to a small multiple of 128 lanes (not to a full tile),
    caps tiles at `max_tile_lanes` to amortize the ~0.35 us per-grid-step
    overhead, and forces an even tile count >= 2 when the batch allows so
    v7x's two TensorCores both get work on the "parallel" grid axis.
    """
    if tile_b is not None:
        tile_b = _round_up(tile_b, 128)
        b_pad = _round_up(B, tile_b)
        return tile_b, b_pad, b_pad // tile_b

    b128 = _round_up(B, 128)
    n_groups = b128 // 128
    if n_groups <= 1:
        return 128, 128, 1

    n_tiles = max(2, pl.cdiv(b128, max_tile_lanes))
    n_tiles += n_tiles & 1                       # even count for the v7x 2-TC split
    groups_per_tile = pl.cdiv(n_groups, n_tiles)
    tile_b = groups_per_tile * 128
    b_pad = tile_b * n_tiles                     # waste <= (n_tiles-1)*128 + 127 rows
    return tile_b, b_pad, n_tiles


def _resolve_act_dtype(compute_dtype):
    """tanh dtype: bf16 on chips with a bf16 EUP path (v6e/v7x), else f32."""
    if jnp.dtype(compute_dtype) == jnp.dtype(jnp.float32):
        return jnp.float32
    try:
        kind = jax.devices()[0].device_kind.lower()
    except Exception:  # pragma: no cover - defensive; fall back to the safe path
        kind = ""
    if any(old in kind for old in ("v2", "v3", "v4", "v5")):
        return jnp.float32  # no bf16 EUP/VPU on these generations
    return compute_dtype


def mlp_critic_kernel(x_ref, w1_ref, b1_ref, w2_ref, b2_ref, w3_ref, b3_ref, o_ref,
                      *, act_dtype):
    """Fused 3-layer MLP critic, batch-on-lanes layout.

    x_ref : (obs_dim, TILE_B)   batch on the 128-lane axis
    w1    : (h1, obs_dim)   b1 : (h1, 1)
    w2    : (h2, h1)        b2 : (h2, 1)
    w3    : (h2, 1)         b3 : (1, 1)
    o_ref : (1, TILE_B)         lane-dense output
    """
    x = x_ref[...]
    stream_dtype = x.dtype

    # Layer 1: MXU matmul with f32 accumulation; tanh on the EUP in act_dtype
    # (bf16 on v6e/v7x when streaming bf16, f32 otherwise).
    z1 = jnp.dot(w1_ref[...], x, preferred_element_type=jnp.float32) + b1_ref[...]
    h1 = jnp.tanh(z1.astype(act_dtype))

    # Layer 2: feed the MXU in the streaming dtype (no-op cast when act_dtype
    # already matches it, i.e. the bf16 fast path deletes the VPU re-cast).
    z2 = (jnp.dot(w2_ref[...], h1.astype(stream_dtype),
                  preferred_element_type=jnp.float32) + b2_ref[...])
    h2 = jnp.tanh(z2.astype(act_dtype))

    # Layer 3 (single output feature): skip the MXU — VPU multiply + sublane
    # reduce (XLU) produces the (1, TILE_B) value row directly, in f32.
    v = (jnp.sum(w3_ref[...] * h2.astype(jnp.float32), axis=0, keepdims=True)
         + b3_ref[...])
    o_ref[...] = v.astype(o_ref.dtype)


@functools.partial(jax.jit, static_argnames=("tile_b", "compute_dtype"))
def mlp_critic_forward(obs, params, tile_b=None, compute_dtype=jnp.float32):
    """obs: (B, obs_dim) float32. Returns (B,) state values (squeezed)."""
    B, obs_dim = obs.shape
    w1, b1 = params["w1"], params["b1"]
    w2, b2 = params["w2"], params["b2"]
    w3, b3 = params["w3"], params["b3"]
    h1, h2 = w1.shape[0], w2.shape[0]

    tile_b, b_pad, n_tiles = _choose_tiling(B, tile_b)
    act_dtype = _resolve_act_dtype(compute_dtype)

    # Layout glue: cast FIRST (halves the rewritten bytes when streaming bf16),
    # then transpose/pad once to batch-on-lanes.
    # TODO(synk): ideally produce obs in (obs_dim, B) layout upstream and skip
    # this HBM round trip entirely.
    x = obs.astype(compute_dtype).T                      # (obs_dim, B)
    x = jnp.pad(x, ((0, 0), (0, b_pad - B)))             # (obs_dim, b_pad)

    w1c = w1.astype(compute_dtype)
    w2c = w2.astype(compute_dtype)

    const = lambda i: (0, 0)  # resident weights / biases

    itemsize = jnp.dtype(compute_dtype).itemsize
    cost = pl.CostEstimate(
        flops=int(b_pad * (2 * obs_dim * h1 + 2 * h1 * h2 + 2 * h2)),
        transcendentals=int(b_pad * (h1 + h2)),
        bytes_accessed=int(
            b_pad * obs_dim * itemsize           # obs stream (dominant)
            + b_pad * 4                          # output
            + (w1c.size + w2c.size) * itemsize   # resident weights
            + (w3.size + b1.size + b2.size + b3.size) * 4
        ),
    )

    out = pl.pallas_call(
        functools.partial(mlp_critic_kernel, act_dtype=act_dtype),
        out_shape=jax.ShapeDtypeStruct((1, b_pad), jnp.float32),
        grid_spec=pltpu.PrefetchScalarGridSpec(
            num_scalar_prefetch=0,
            grid=(n_tiles,),
            in_specs=[
                pl.BlockSpec((obs_dim, tile_b), lambda i: (0, i)),  # obs tile
                pl.BlockSpec((h1, obs_dim), const),                 # w1
                pl.BlockSpec((h1, 1), const),                       # b1
                pl.BlockSpec((h2, h1), const),                      # w2
                pl.BlockSpec((h2, 1), const),                       # b2
                pl.BlockSpec((h2, 1), const),                       # w3 (as column)
                pl.BlockSpec((1, 1), const),                        # b3
            ],
            out_specs=pl.BlockSpec((1, tile_b), lambda i: (0, i)),
        ),
        compiler_params=pltpu.CompilerParams(
            dimension_semantics=("parallel",),        # v7x: 2 TCs split the tiles
            vmem_limit_bytes=32 * 1024 * 1024,        # raises v5e's 16 MiB default
        ),
        cost_estimate=cost,
    )(x, w1c, b1, w2c, b2, w3, b3)

    # torch.squeeze(v, -1): drop batch padding, return (B,).
    return out[0, :B]


def init_params(key, obs_dim, hidden_sizes):
    """PyTorch-style default Linear init (uniform ±1/sqrt(fan_in)).

    Weights stored in PyTorch (out_features, in_features) layout for the
    batch-on-lanes W @ X kernel; biases as (out_features, 1).  The final
    layer's weight is stored transposed as (h_last, 1) because the kernel
    consumes it as a VPU multiply + reduce rather than an MXU matmul.
    """
    sizes = [obs_dim] + list(hidden_sizes) + [1]
    params = {}
    for j in range(len(sizes) - 1):
        fan_in, fan_out = sizes[j], sizes[j + 1]
        key, kw, kb = jax.random.split(key, 3)
        bound = 1.0 / float(fan_in) ** 0.5
        params[f"w{j + 1}"] = jax.random.uniform(
            kw, (fan_out, fan_in), jnp.float32, -bound, bound
        )
        params[f"b{j + 1}"] = jax.random.uniform(
            kb, (fan_out, 1), jnp.float32, -bound, bound
        )
    last = len(sizes) - 1
    params[f"w{last}"] = params[f"w{last}"].T  # (h_last, 1)
    return params


def reference_forward(obs, params):
    """Pure-JAX reference of the same MLP (correctness check)."""
    h = jnp.tanh(obs @ params["w1"].T + params["b1"][:, 0])
    h = jnp.tanh(h @ params["w2"].T + params["b2"][:, 0])
    v = h @ params["w3"] + params["b3"][:, 0]
    return v[:, 0]


if __name__ == "__main__":
    key = jax.random.PRNGKey(0)
    k_obs, k_obs2, k_params = jax.random.split(key, 3)

    obs_dim = 16
    hidden_sizes = (32, 32)
    params = init_params(k_params, obs_dim, hidden_sizes)

    # Small-batch check (single 128-lane tile).
    B = 8
    obs = jax.random.normal(k_obs, (B, obs_dim), jnp.float32)
    v = jax.block_until_ready(mlp_critic_forward(obs, params))
    v_ref = reference_forward(obs, params)
    assert v.shape == (B,)
    assert jnp.allclose(v, v_ref, atol=1e-5, rtol=1e-5)

    # Multi-tile check (exercises the even-tile split + 128-lane padding path).
    B2 = 300
    obs2 = jax.random.normal(k_obs2, (B2, obs_dim), jnp.float32)
    v2 = jax.block_until_ready(mlp_critic_forward(obs2, params))
    v2_ref = reference_forward(obs2, params)
    assert v2.shape == (B2,)
    assert jnp.allclose(v2, v2_ref, atol=1e-5, rtol=1e-5)

    # bf16 streaming path (halves obs HBM traffic on all generations; bf16 tanh
    # on v6e/v7x only): loose tolerance.
    v_bf16 = jax.block_until_ready(
        mlp_critic_forward(obs, params, compute_dtype=jnp.bfloat16)
    )
    assert jnp.allclose(v_bf16, v_ref, atol=0.1, rtol=0.1)

    print("KERNEL_OK")
</pallas_src>

<mosaic_0001>
module attributes {stable_mosaic.version = 11 : i64} {
  func.func @mlp_critic_kernel(%arg0: i32, %arg1: memref<16x128xf32, #tpu.memory_space<vmem>>, %arg2: memref<32x16xf32, #tpu.memory_space<vmem>>, %arg3: memref<32x1xf32, #tpu.memory_space<vmem>>, %arg4: memref<32x32xf32, #tpu.memory_space<vmem>>, %arg5: memref<32x1xf32, #tpu.memory_space<vmem>>, %arg6: memref<32x1xf32, #tpu.memory_space<vmem>>, %arg7: memref<1x1xf32, #tpu.memory_space<vmem>>, %arg8: memref<1x128xf32, #tpu.memory_space<vmem>>) attributes {dimension_semantics = [#tpu.dimension_semantics<parallel>], iteration_bounds = array<i64: 1>, scalar_prefetch = 0 : i64, scratch_operands = 0 : i64, tpu.core_type = #tpu.core_type<tc>, window_params = [{transform_indices = @transform_0, window_bounds = array<i64: 16, 128>}, {pipeline_mode = #tpu.pipeline_mode<synchronous>, transform_indices = @transform_1, window_bounds = array<i64: 32, 16>}, {pipeline_mode = #tpu.pipeline_mode<synchronous>, transform_indices = @transform_2, window_bounds = array<i64: 32, 1>}, {pipeline_mode = #tpu.pipeline_mode<synchronous>, transform_indices = @transform_3, window_bounds = array<i64: 32, 32>}, {pipeline_mode = #tpu.pipeline_mode<synchronous>, transform_indices = @transform_4, window_bounds = array<i64: 32, 1>}, {pipeline_mode = #tpu.pipeline_mode<synchronous>, transform_indices = @transform_5, window_bounds = array<i64: 32, 1>}, {pipeline_mode = #tpu.pipeline_mode<synchronous>, transform_indices = @transform_6, window_bounds = array<i64: 1, 1>}, {transform_indices = @transform_7, window_bounds = array<i64: 1, 128>}]} {
    %c0 = arith.constant 0 : index
    %c0_0 = arith.constant 0 : index
    %0 = vector.load %arg1[%c0, %c0_0] : memref<16x128xf32, #tpu.memory_space<vmem>>, vector<16x128xf32>
    %c0_1 = arith.constant 0 : index
    %c0_2 = arith.constant 0 : index
    %1 = vector.load %arg2[%c0_1, %c0_2] : memref<32x16xf32, #tpu.memory_space<vmem>>, vector<32x16xf32>
    %cst = arith.constant dense<0.000000e+00> : vector<32x128xf32>
    %2 = tpu.matmul %1, %0, %cst {dimension_numbers = #tpu.dot_dimension_numbers<[1], [0], [0], [1], [0, 0, 1, 1], [], []>} : vector<32x16xf32>, vector<16x128xf32>, vector<32x128xf32> -> vector<32x128xf32>
    %c0_3 = arith.constant 0 : index
    %c0_4 = arith.constant 0 : index
    %3 = vector.load %arg3[%c0_3, %c0_4] : memref<32x1xf32, #tpu.memory_space<vmem>>, vector<32x1xf32>
    %4 = vector.broadcast %3 : vector<32x1xf32> to vector<32x128xf32>
    %5 = arith.addf %2, %4 : vector<32x128xf32>
    %6 = math.tanh %5 : vector<32x128xf32>
    %c0_5 = arith.constant 0 : index
    %c0_6 = arith.constant 0 : index
    %7 = vector.load %arg4[%c0_5, %c0_6] : memref<32x32xf32, #tpu.memory_space<vmem>>, vector<32x32xf32>
    %cst_7 = arith.constant dense<0.000000e+00> : vector<32x128xf32>
    %8 = tpu.matmul %7, %6, %cst_7 {dimension_numbers = #tpu.dot_dimension_numbers<[1], [0], [0], [1], [0, 0, 1, 1], [], []>} : vector<32x32xf32>, vector<32x128xf32>, vector<32x128xf32> -> vector<32x128xf32>
    %c0_8 = arith.constant 0 : index
    %c0_9 = arith.constant 0 : index
    %9 = vector.load %arg5[%c0_8, %c0_9] : memref<32x1xf32, #tpu.memory_space<vmem>>, vector<32x1xf32>
    %10 = vector.broadcast %9 : vector<32x1xf32> to vector<32x128xf32>
    %11 = arith.addf %8, %10 : vector<32x128xf32>
    %12 = math.tanh %11 : vector<32x128xf32>
    %c0_10 = arith.constant 0 : index
    %c0_11 = arith.constant 0 : index
    %13 = vector.load %arg6[%c0_10, %c0_11] : memref<32x1xf32, #tpu.memory_space<vmem>>, vector<32x1xf32>
    %14 = vector.broadcast %13 : vector<32x1xf32> to vector<32x128xf32>
    %15 = arith.mulf %14, %12 : vector<32x128xf32>
    %cst_12 = arith.constant dense<0.000000e+00> : vector<128xf32>
    %16 = vector.multi_reduction <add>, %15, %cst_12 [0] : vector<32x128xf32> to vector<128xf32>
    %17 = vector.shape_cast %16 : vector<128xf32> to vector<1x128xf32>
    %c0_13 = arith.constant 0 : index
    %c0_14 = arith.constant 0 : index
    %18 = vector.load %arg7[%c0_13, %c0_14] : memref<1x1xf32, #tpu.memory_space<vmem>>, vector<1x1xf32>
    %19 = vector.broadcast %18 : vector<1x1xf32> to vector<1x128xf32>
    %20 = arith.addf %17, %19 : vector<1x128xf32>
    %c0_15 = arith.constant 0 : index
    %c0_16 = arith.constant 0 : index
    %21 = vector.load %arg8[%c0_15, %c0_16] : memref<1x128xf32, #tpu.memory_space<vmem>>, vector<1x128xf32>
    tpu.vector_store %arg8[%c0_15, %c0_16], %20 {strides = array<i32>} : memref<1x128xf32, #tpu.memory_space<vmem>>, vector<1x128xf32>,
    return
  }
  func.func @transform_0(%arg0: i32) -> (i32, i32) {
    %c0_i32 = arith.constant 0 : i32
    %c0_i32_0 = arith.constant 0 : i32
    return %c0_i32, %arg0 : i32, i32
  }
  func.func @transform_1(%arg0: i32) -> (i32, i32) {
    %c0_i32 = arith.constant 0 : i32
    %c0_i32_0 = arith.constant 0 : i32
    %c0_i32_1 = arith.constant 0 : i32
    return %c0_i32, %c0_i32_0 : i32, i32
  }
  func.func @transform_2(%arg0: i32) -> (i32, i32) {
    %c0_i32 = arith.constant 0 : i32
    %c0_i32_0 = arith.constant 0 : i32
    %c0_i32_1 = arith.constant 0 : i32
    return %c0_i32, %c0_i32_0 : i32, i32
  }
  func.func @transform_3(%arg0: i32) -> (i32, i32) {
    %c0_i32 = arith.constant 0 : i32
    %c0_i32_0 = arith.constant 0 : i32
    %c0_i32_1 = arith.constant 0 : i32
    return %c0_i32, %c0_i32_0 : i32, i32
  }
  func.func @transform_4(%arg0: i32) -> (i32, i32) {
    %c0_i32 = arith.constant 0 : i32
    %c0_i32_0 = arith.constant 0 : i32
    %c0_i32_1 = arith.constant 0 : i32
    return %c0_i32, %c0_i32_0 : i32, i32
  }
  func.func @transform_5(%arg0: i32) -> (i32, i32) {
    %c0_i32 = arith.constant 0 : i32
    %c0_i32_0 = arith.constant 0 : i32
    %c0_i32_1 = arith.constant 0 : i32
    return %c0_i32, %c0_i32_0 : i32, i32
  }
  func.func @transform_6(%arg0: i32) -> (i32, i32) {
    %c0_i32 = arith.constant 0 : i32
    %c0_i32_0 = arith.constant 0 : i32
    %c0_i32_1 = arith.constant 0 : i32
    return %c0_i32, %c0_i32_0 : i32, i32
  }
  func.func @transform_7(%arg0: i32) -> (i32, i32) {
    %c0_i32 = arith.constant 0 : i32
    %c0_i32_0 = arith.constant 0 : i32
    return %c0_i32, %arg0 : i32, i32
  }
}

</mosaic_0001>

<bundles_post_ra>
// kernel: mlp_critic_forward.1
= control target key start
LH: loop header
LB: loop body
LE: loop exit
PB: predicated region body
PF: predicated region fallthrough
CT: control target
= control target key end

     0   :  { %vm58_vm0 = vcmask 130048   ;;  %v420_v3 = vmov 0   ;;  %vm188_vm1 = vcmask 261120   ;;  %s541_s0 = inlined_call_operand.vmem [shape: f32[16,128], index: 0, kind: input, shape index: {}]   ;;  %s542_s1 = inlined_call_operand.vmem [shape: f32[32,16], index: 1, kind: input, shape index: {}]   ;;  %s543_s2 = inlined_call_operand.vmem [shape: f32[32,1], index: 2, kind: input, shape index: {}]   ;;  %s544_s6 = inlined_call_operand.<no memory space> [shape: f32[1,1], index: 6, kind: input, shape index: {}]   ;;  %s545_s4 = inlined_call_operand.vmem [shape: f32[32,1], index: 4, kind: input, shape index: {}]   ;;  %s546_s5 = inlined_call_operand.vmem [shape: f32[32,1], index: 5, kind: input, shape index: {}]   ;;  %s547_s3 = inlined_call_operand.vmem [shape: f32[32,32], index: 3, kind: input, shape index: {}]   ;;  %s548_s7 = inlined_call_operand.vmem [shape: f32[1,128], index: 7, kind: output, shape index: {}]  }
   0x1   :  { %v28_v0 = vld [vmem:[%s541_s0] sm:$0xff]  ;;  %v29_v1 = vld [vmem:[%s541_s0 + $0x8] sm:$0xff]  ;;  %402 = vset.pattern.permute.xlu0 %v420_v3  ;;  %403 = vset.pattern.permute.xlu1 %v420_v3  ;;  %v12_v4 = vstv %s544_s6  ;;  %v36_v7 = vld [vmem:[%s543_s2 + $0x10] sm:$0xff] }
   0x2   :  { %v30_v2 = vld [vmem:[%s542_s1] sm:$0xff]  ;;  %v389_v5 = vpack.c.bf16 %v29_v1, %v28_v0  ;;  %13 = vst [vmem:[#allocation2] sm:$0x1] %v12_v4  ;;  %v31_v8 = vld [vmem:[%s542_s1 + $0x8] sm:$0xff]  ;;  %50 = vperm.xlu1 %403, %v36_v7   ;;  %v32_v10 = vld [vmem:[%s542_s1 + $0x10] sm:$0xff] }
   0x3   :  { %369 = vmatprep.mubr.msk.f32.mxu0 %vm58_vm0, %v30_v2  ;;  %v34_v6 = vld [vmem:[%s543_s2] sm:$0xff]  ;;  %v35_v9 = vld [vmem:[%s543_s2 + $0x8] sm:$0xff]  ;;  %v37_v11 = vld [vmem:[%s543_s2 + $0x18] sm:$0xff] }
   0x4   :  { %390 = vmatprep.subr.bf16.mxu0 %v389_v5  ;;  %40 = vperm.xlu0 %402, %v34_v6   ;;  %v33_v12 = vld [vmem:[%s542_s1 + $0x18] sm:$0xff]  ;;  %v164_v13 = vld [vmem:[%s545_s4] sm:$0xff]  ;;  %v165_v14 = vld [vmem:[%s545_s4 + $0x8] sm:$0xff]  ;;  %v333_v6 = vlaneseq }
   0x5   :  { %392 = vmatpush3.bf16.msra.mxu0 %v389_v5  ;;  %v166_v15 = vld [vmem:[%s545_s4 + $0x10] sm:$0xff]  ;;  %v167_v16 = vld [vmem:[%s545_s4 + $0x18] sm:$0xff]  ;;  %v290_v17 = vld [vmem:[%s546_s5] sm:$0xff] }
   0x6   :  { %55 = vperm.xlu1 %403, %v37_v11   ;;  %v291_v18 = vld [vmem:[%s546_s5 + $0x8] sm:$0xff]  ;;  %v292_v19 = vld [vmem:[%s546_s5 + $0x10] sm:$0xff]  ;;  %v293_v20 = vld [vmem:[%s546_s5 + $0x18] sm:$0xff] }
   0x7   :  { %v160_v22 = vld [vmem:[%s547_s3] sm:$0xff]  ;;  %v161_v41 = vld [vmem:[%s547_s3 + $0x8] sm:$0xff]  ;;  %v162_v42 = vld [vmem:[%s547_s3 + $0x10] sm:$0xff] }
   0x8   :  { %370 = vmatmul.mubr.msk.f32.vlgmr.msra.gmra.mrb[0].mxu0 %vm58_vm0, %v31_v8  ;;  %45 = vperm.xlu0 %402, %v35_v9   ;;  %v163_v43 = vld [vmem:[%s547_s3 + $0x18] sm:$0xff]  ;;  %v334_v9 = vshrl.u32 %v333_v6, 7 }
   0x9   :  { %372 = vmatprep.mubr.msk.f32.mxu0 %vm58_vm0, %v32_v10  ;;  %v327_v21 = vld [vmem:[#allocation2] sm:$0x1]  ;;  %383 = vmatprep.mubr.msk.f32.mxu1 %vm188_vm1, %v160_v22 }
   0xa   :  { %175 = vperm.xlu1 %403, %v165_v14  }
   0xc   :  { %373 = vmatmul.mubr.msk.f32.gmra.mrb[2].mxu0 %vm58_vm0, %v33_v12  ;;  %170 = vperm.xlu0 %402, %v164_v13   ;;  %v335_v12 = vsub.s32 0, %v334_v9 }
   0xe   :  { %185 = vperm.xlu1 %403, %v167_v16  }
  0x10   :  { %180 = vperm.xlu0 %402, %v166_v15  }
  0x12   :  { %301 = vperm.xlu1 %403, %v291_v18  }
  0x14   :  { %296 = vperm.xlu0 %402, %v290_v17  }
  0x16   :  { %311 = vperm.xlu1 %403, %v293_v20  }
  0x18   :  { %306 = vperm.xlu0 %402, %v292_v19  }
  0x1c   :  { %330 = vperm.xlu0 %402, %v327_v21  }
  0x81   :  { %v51_v24 = vpop.permute.xlu1 %50 }
  0x83   :  { %v41_v23 = vpop.permute.xlu0 %40 }
  0x85   :  { %v56_v30 = vpop.permute.xlu1 %55 }
  0x87   :  { %v46_v25 = vpop.permute.xlu0 %45 }
  0x89   :  { %v176_v44 = vpop.permute.xlu1 %175 }
  0x8b   :  { %v171_v45 = vpop.permute.xlu0 %170 }
  0x8d   :  { %v186_v50 = vpop.permute.xlu1 %185 }
  0x8f   :  { %v181_v52 = vpop.permute.xlu0 %180 }
  0x91   :  { %v302_v58 = vpop.permute.xlu1 %301 }
  0x93   :  { %v297_v56 = vpop.permute.xlu0 %296 }
  0x95   :  { %v312_v3 = vpop.permute.xlu1 %311 }
  0x97   :  { %v307_v1 = vpop.permute.xlu0 %306 }
  0x9b   :  { %v331_v14 = vpop.permute.xlu0 %330 }
  0x9c   :  { %v336_v16 = vrot.slane %v331_v14, %v335_v12 }
  0xdb   :  { %v371_v26 = vpop.f32.mrb[0].mxu0 }
  0xdc   :  { %v143_v27 = vadd.f32 %v371_v26, %v46_v25  ;;  %v137_v28 = vpop.f32.mrb[1].mxu0 }
  0xdd   :  { %v138_v29 = vadd.f32 %v137_v28, %v41_v23 }
  0xde   :  { %404 = vtanh.f32 %v143_v27 }
  0xdf   :  { %406 = vtanh.f32 %v138_v29  ;;  %v374_v31 = vpop.f32.mrb[2].mxu0 }
  0xe0   :  { %v153_v32 = vadd.f32 %v374_v31, %v56_v30  ;;  %v147_v33 = vpop.f32.mrb[3].mxu0 }
  0xe1   :  { %v148_v34 = vadd.f32 %v147_v33, %v51_v24 }
  0xe2   :  { %408 = vtanh.f32 %v153_v32 }
  0xe3   :  { %410 = vtanh.f32 %v148_v34 }
  0xe8   :  { %v405_v35 = vpop.eup %404 }
  0xe9   :  { %v407_v36 = vpop.eup %406 }
  0xea   :  { %v393_v37 = vpack.c.bf16 %v405_v35, %v407_v36 }
  0xec   :  { %v409_v38 = vpop.eup %408  ;;  %394 = vmatprep.subr.bf16.mxu1 %v393_v37 }
  0xed   :  { %v411_v39 = vpop.eup %410  ;;  %396 = vmatpush3.bf16.msra.mxu1 %v393_v37 }
  0xee   :  { %v397_v40 = vpack.c.bf16 %v409_v38, %v411_v39 }
  0xf0   :  { %398 = vmatprep.subr.bf16.mxu1 %v397_v40 }
  0xf1   :  { %400 = vmatpush3.bf16.msra.mxu1 %v397_v40 }
  0xf4   :  { %384 = vmatmul.mubr.msk.f32.vlgmr.msra.gmra.mrb[0].mxu1 %vm188_vm1, %v161_v41 }
  0xf5   :  { %386 = vmatprep.mubr.msk.f32.mxu1 %vm188_vm1, %v162_v42 }
  0xf8   :  { %387 = vmatmul.mubr.msk.f32.gmra.mrb[2].mxu1 %vm188_vm1, %v163_v43 }
 0x1c7   :  { %v385_v46 = vpop.f32.mrb[0].mxu1 }
 0x1c8   :  { %v273_v47 = vadd.f32 %v385_v46, %v176_v44  ;;  %v267_v48 = vpop.f32.mrb[1].mxu1 }
 0x1c9   :  { %v268_v49 = vadd.f32 %v267_v48, %v171_v45 }
 0x1ca   :  { %412 = vtanh.f32 %v273_v47 }
 0x1cb   :  { %414 = vtanh.f32 %v268_v49  ;;  %v388_v51 = vpop.f32.mrb[2].mxu1 }
 0x1cc   :  { %v283_v53 = vadd.f32 %v388_v51, %v186_v50  ;;  %v277_v54 = vpop.f32.mrb[3].mxu1 }
 0x1cd   :  { %v278_v55 = vadd.f32 %v277_v54, %v181_v52 }
 0x1ce   :  { %416 = vtanh.f32 %v283_v53 }
 0x1cf   :  { %418 = vtanh.f32 %v278_v55 }
 0x1d4   :  { %v413_v57 = vpop.eup %412 }
 0x1d5   :  { %v415_v59 = vpop.eup %414  ;;  %v315_v60 = vmul.f32 %v413_v57, %v302_v58 }
 0x1d6   :  { %v314_v61 = vmul.f32 %v415_v59, %v297_v56 }
 0x1d8   :  { %v417_v62 = vpop.eup %416  ;;  %v318_v63 = vadd.f32 %v315_v60, %v314_v61 }
 0x1d9   :  { %v419_v0 = vpop.eup %418  ;;  %v317_v4 = vmul.f32 %v417_v62, %v312_v3 }
 0x1da   :  { %v316_v2 = vmul.f32 %v419_v0, %v307_v1 }
 0x1dc   :  { %v319_v5 = vadd.f32 %v318_v63, %v316_v2 }
 0x1de   :  { %v320_v7 = vadd.f32 %v319_v5, %v317_v4 }
 0x1e0   :  { %v321_v8 = vrot.slane %v320_v7, 4 }
 0x1e2   :  { %v322_v10 = vadd.f32 %v321_v8, %v320_v7 }
 0x1e4   :  { %v323_v11 = vrot.slane %v322_v10, 2 }
 0x1e6   :  { %v324_v13 = vadd.f32 %v323_v11, %v322_v10 }
 0x1e8   :  { %v325_v15 = vrot.slane %v324_v13, 1 }
 0x1ea   :  { %v326_v17 = vadd.f32 %v325_v15, %v324_v13 }
 0x1ec   :  { %v337_v18 = vadd.f32 %v336_v16, %v326_v17 }
 0x1ee   :  { %338 = vst [vmem:[%s548_s7] sm:$0x1] %v337_v18 }

</bundles_post_ra>
